<compile_context>
chip_gen: v7x
topology: tpu7x:2x2x1
jax: 0.10.0
libtpu: 0.0.40
codegen_flags: <defaults>
</compile_context>

<pallas_src>
import jax
import jax.numpy as jnp
from jax.experimental import pallas as pl
from jax.experimental.pallas import tpu as pltpu

_LANE = 128
_FLAT_TILE_COLS = 1024          # lane-dense width for flattened/degenerate shapes
_MAX_TILE_ROWS = 4096
_MIN_KERNEL_BYTES = 256 * 1024  # below this, plain XLA is strictly faster


def _round_up(x: int, m: int) -> int:
    return ((x + m - 1) // m) * m


def _sublane_multiple(dtype) -> int:
    """Native sublane packing: 8 for 32-bit, 16 for 16-bit, 32 for 8-bit dtypes."""
    return max(8, 32 // jnp.dtype(dtype).itemsize)


def _vmem_capacity_bytes() -> int:
    try:
        return int(pltpu.get_tpu_info().vmem_capacity_bytes)
    except Exception:  # conservative fallback, safe on v5e/v6e/v7x
        return 64 * 1024 * 1024


def _cores_per_device() -> int:
    """Best-effort TensorCores-per-device (2 on v7x, 1 on v5e/v6e)."""
    try:
        info = pltpu.get_tpu_info()
        for attr in ("num_cores", "core_count", "num_tensorcores", "tensorcore_count"):
            v = getattr(info, attr, None)
            if isinstance(v, int) and v > 0:
                return v
    except Exception:
        pass
    try:
        kind = str(jax.devices()[0].device_kind).lower()
        if "v7" in kind or "7x" in kind:
            return 2
    except Exception:
        pass
    return 1


def _linreg_kernel(w_ref, b_ref, x_ref, o_ref):
    # w_ref / b_ref: (1, 1) f32 scalars in SMEM; x_ref / o_ref: (TR, TC) VMEM tiles.
    w = w_ref[0, 0]
    b = b_ref[0, 0]
    # Upcast in-register (VPU): low-precision inputs are DMA'd in their native
    # dtype instead of materializing an f32 copy in HBM.
    o_ref[...] = (w * x_ref[...].astype(jnp.float32) + b).astype(o_ref.dtype)


def _choose_tiles(R: int, C: int, in_itemsize: int, out_itemsize: int,
                  sub: int, num_cores: int):
    """Pick VMEM-budgeted, lane-dense tiles and a scoped-VMEM limit."""
    vmem_cap = _vmem_capacity_bytes()
    if vmem_cap >= 96 * 1024 * 1024:        # v5e / v6e: 128 MiB physical VMEM
        vmem_limit = 64 * 1024 * 1024
        max_cols = 8192
    else:                                   # v7x: 64 MiB physical per TensorCore
        vmem_limit = min(32 * 1024 * 1024, max(vmem_cap // 2, 16 * 1024 * 1024))
        max_cols = 2048

    # Prefer full-C blocking (split rows, not columns) when C fits the lane cap;
    # ragged boundary columns are handled by cdiv partial blocks.
    tile_cols = C if C <= max_cols else max_cols

    # Double-buffered (in + out) tiles with ~25% headroom.
    per_row_bytes = tile_cols * (in_itemsize + out_itemsize)
    budget_rows = (vmem_limit * 3 // 4) // (2 * per_row_bytes)
    budget_rows = max(sub, (budget_rows // sub) * sub)
    budget_rows = min(budget_rows, _MAX_TILE_ROWS)

    # Enough row steps for prefetch/writeback overlap (and a balanced split
    # across both TensorCores on v7x); only shrink below the VMEM budget when
    # the whole input would otherwise fit in one or two tiles.
    min_steps = max(4, 2 * num_cores)
    target_rows = max(sub, _round_up(pl.cdiv(R, min_steps), sub))
    tile_rows = min(budget_rows, target_rows)
    if tile_rows >= R:
        tile_rows = R  # full second-minor dim is always a legal block shape
    return tile_rows, tile_cols, vmem_limit


def _run_kernel(x2: jax.Array, w2: jax.Array, b2: jax.Array, out_dtype) -> jax.Array:
    """pallas_call over a 2-D lane-dense view (last dim on lanes)."""
    R, C = x2.shape
    in_itemsize = x2.dtype.itemsize
    out_itemsize = jnp.dtype(out_dtype).itemsize
    # Sublane rounding must respect both the input and the output packing.
    sub = max(_sublane_multiple(x2.dtype), _sublane_multiple(out_dtype))
    num_cores = _cores_per_device()

    tile_rows, tile_cols, vmem_limit = _choose_tiles(
        R, C, in_itemsize, out_itemsize, sub, num_cores)
    grid = (pl.cdiv(R, tile_rows), pl.cdiv(C, tile_cols))

    # Explicit per-core sharding of the row axis on 2-TC chips (v7x); plain
    # "parallel" elsewhere (measured no-op vs "arbitrary", but harmless).
    if num_cores >= 2 and grid[0] >= 2:
        dim_sem = (pltpu.CORE_PARALLEL, pltpu.PARALLEL)
    else:
        dim_sem = ("parallel", "parallel")

    cost = pl.CostEstimate(
        flops=2 * R * C,
        transcendentals=0,
        bytes_accessed=R * C * (in_itemsize + out_itemsize) + 8,
    )

    return pl.pallas_call(
        _linreg_kernel,
        out_shape=jax.ShapeDtypeStruct((R, C), out_dtype),
        grid_spec=pltpu.PrefetchScalarGridSpec(
            num_scalar_prefetch=0,
            grid=grid,
            in_specs=[
                pl.BlockSpec((1, 1), lambda i, j: (0, 0), memory_space=pltpu.SMEM),
                pl.BlockSpec((1, 1), lambda i, j: (0, 0), memory_space=pltpu.SMEM),
                pl.BlockSpec((tile_rows, tile_cols), lambda i, j: (i, j)),
            ],
            out_specs=pl.BlockSpec((tile_rows, tile_cols), lambda i, j: (i, j)),
        ),
        compiler_params=pltpu.CompilerParams(
            dimension_semantics=dim_sem,
            vmem_limit_bytes=vmem_limit,
        ),
        cost_estimate=cost,
    )(w2, b2, x2)


def linear_regression_forward(x: jax.Array, weights: jax.Array, bias: jax.Array,
                              *, out_dtype=None,
                              min_kernel_bytes: int = _MIN_KERNEL_BYTES) -> jax.Array:
    """Computes weights * x + bias (scalar weights/bias), matching the PyTorch module.

    out_dtype defaults to x.dtype (bf16 in -> bf16 out); pass jnp.float32 to
    force an f32 result. Math is always done in f32.
    """
    out_dtype = jnp.dtype(x.dtype if out_dtype is None else out_dtype)
    w2 = jnp.asarray(weights, jnp.float32).reshape(1, 1)
    b2 = jnp.asarray(bias, jnp.float32).reshape(1, 1)
    w = w2[0, 0]
    b = b2[0, 0]

    orig_shape = x.shape
    nbytes = x.size * x.dtype.itemsize

    def _xla(v):
        return (w * v.astype(jnp.float32) + b).astype(out_dtype)

    # Tiny inputs: kernel launch + pipeline warmup exceed the data movement.
    if x.ndim == 0 or nbytes < min_kernel_bytes:
        return _xla(x)

    # Already lane-dense last dim (multiple of 128) with a non-trivial number of
    # rows: collapse leading dims only (no relayout) and stream directly.
    last = x.shape[-1] if x.ndim >= 1 else 1
    rows = x.size // max(last, 1)
    if x.ndim >= 2 and last % _LANE == 0 and last > 0 and rows >= 8:
        y2 = _run_kernel(x.reshape(rows, last), w2, b2, out_dtype)
        return y2.reshape(orig_shape)

    # Degenerate shapes ((N, 1), 1-D, narrow/ragged last dim): flatten and
    # re-block into lane-dense (rows, 1024) tiles; the sub-1024 remainder is a
    # handful of elements and goes through fused XLA.
    flat = x.reshape(-1)
    n = flat.shape[0]
    main = (n // _FLAT_TILE_COLS) * _FLAT_TILE_COLS
    if main == 0:
        return _xla(x)
    x2 = flat[:main].reshape(main // _FLAT_TILE_COLS, _FLAT_TILE_COLS)
    y_main = _run_kernel(x2, w2, b2, out_dtype).reshape(-1)
    if main < n:
        y_flat = jnp.concatenate([y_main, _xla(flat[main:])])
    else:
        y_flat = y_main
    return y_flat.reshape(orig_shape)


if __name__ == "__main__":
    key = jax.random.PRNGKey(0)
    kx, kw, kb, k1, k2, k3 = jax.random.split(key, 6)

    # Deterministic "randn"-style parameter init (module: torch.randn(1) each).
    weights = jax.random.normal(kw, (1,), dtype=jnp.float32)
    bias = jax.random.normal(kb, (1,), dtype=jnp.float32)

    def ref(v, dt=None):
        dt = v.dtype if dt is None else dt
        return (weights[0] * v.astype(jnp.float32) + bias[0]).astype(dt)

    # 1) Lane-dense f32 2-D input -> direct streaming kernel path.
    x = jax.random.normal(kx, (512, 512), dtype=jnp.float32)
    y = jax.block_until_ready(linear_regression_forward(x, weights, bias))
    assert jnp.allclose(y, ref(x), atol=1e-6, rtol=1e-6)

    # 2) Canonical linear-regression shape (N, 1): flattened lane-dense
    #    re-block path (kernel over the 1024-wide slab + XLA remainder).
    xN1 = jax.random.normal(k1, (100_000, 1), dtype=jnp.float32)
    yN1 = jax.block_until_ready(linear_regression_forward(xN1, weights, bias))
    assert jnp.allclose(yN1, ref(xN1), atol=1e-6, rtol=1e-6)

    # 3) bf16 input -> bf16 output (dtype-matched writes, 16-row sublane tiles).
    xbf = jax.random.normal(k2, (256, 512), dtype=jnp.bfloat16)
    ybf = jax.block_until_ready(linear_regression_forward(xbf, weights, bias))
    assert ybf.dtype == jnp.bfloat16
    assert jnp.allclose(ybf.astype(jnp.float32), ref(xbf).astype(jnp.float32),
                        atol=1e-2, rtol=1e-2)

    # 4) Tiny ragged input: fused-XLA fallback path (below the 256 KiB cutoff).
    xr = jax.random.normal(k3, (37, 100), dtype=jnp.float32)
    yr = jax.block_until_ready(linear_regression_forward(xr, weights, bias))
    assert jnp.allclose(yr, ref(xr), atol=1e-6, rtol=1e-6)

    print("KERNEL_OK")
</pallas_src>

<mosaic_0001>
module attributes {stable_mosaic.version = 11 : i64} {
  func.func @_linreg_kernel(%arg0: i32, %arg1: i32, %arg2: memref<1x1xf32, #tpu.memory_space<smem>>, %arg3: memref<1x1xf32, #tpu.memory_space<smem>>, %arg4: memref<128x512xf32, #tpu.memory_space<vmem>>, %arg5: memref<128x512xf32, #tpu.memory_space<vmem>>) attributes {dimension_semantics = [#tpu.dimension_semantics<parallel>, #tpu.dimension_semantics<parallel>], iteration_bounds = array<i64: 4, 1>, scalar_prefetch = 0 : i64, scratch_operands = 0 : i64, tpu.core_type = #tpu.core_type<tc>, window_params = [{transform_indices = @transform_0, window_bounds = array<i64: 1, 1>}, {transform_indices = @transform_1, window_bounds = array<i64: 1, 1>}, {transform_indices = @transform_2, window_bounds = array<i64: 128, 512>}, {transform_indices = @transform_3, window_bounds = array<i64: 128, 512>}]} {
    %c0 = arith.constant 0 : index
    %c0_0 = arith.constant 0 : index
    %0 = memref.load %arg2[%c0, %c0_0] : memref<1x1xf32, #tpu.memory_space<smem>>
    %c0_1 = arith.constant 0 : index
    %c0_2 = arith.constant 0 : index
    %1 = memref.load %arg3[%c0_1, %c0_2] : memref<1x1xf32, #tpu.memory_space<smem>>
    %c0_3 = arith.constant 0 : index
    %c0_4 = arith.constant 0 : index
    %2 = vector.load %arg4[%c0_3, %c0_4] : memref<128x512xf32, #tpu.memory_space<vmem>>, vector<128x512xf32>
    %3 = vector.broadcast %0 : f32 to vector<128x512xf32>
    %4 = arith.mulf %3, %2 : vector<128x512xf32>
    %5 = vector.broadcast %1 : f32 to vector<128x512xf32>
    %6 = arith.addf %4, %5 : vector<128x512xf32>
    %c0_5 = arith.constant 0 : index
    %c0_6 = arith.constant 0 : index
    %7 = vector.load %arg5[%c0_5, %c0_6] : memref<128x512xf32, #tpu.memory_space<vmem>>, vector<128x512xf32>
    tpu.vector_store %arg5[%c0_5, %c0_6], %6 {strides = array<i32>} : memref<128x512xf32, #tpu.memory_space<vmem>>, vector<128x512xf32>,
    return
  }
  func.func @transform_0(%arg0: i32, %arg1: i32) -> (i32, i32) {
    %c0_i32 = arith.constant 0 : i32
    %c0_i32_0 = arith.constant 0 : i32
    %c0_i32_1 = arith.constant 0 : i32
    return %c0_i32, %c0_i32_0 : i32, i32
  }
  func.func @transform_1(%arg0: i32, %arg1: i32) -> (i32, i32) {
    %c0_i32 = arith.constant 0 : i32
    %c0_i32_0 = arith.constant 0 : i32
    %c0_i32_1 = arith.constant 0 : i32
    return %c0_i32, %c0_i32_0 : i32, i32
  }
  func.func @transform_2(%arg0: i32, %arg1: i32) -> (i32, i32) {
    %c0_i32 = arith.constant 0 : i32
    return %arg0, %arg1 : i32, i32
  }
  func.func @transform_3(%arg0: i32, %arg1: i32) -> (i32, i32) {
    %c0_i32 = arith.constant 0 : i32
    return %arg0, %arg1 : i32, i32
  }
}

</mosaic_0001>

<bundles_post_ra>
// kernel: tpu_custom_call.1
= control target key start
LH: loop header
LB: loop body
LE: loop exit
PB: predicated region body
PF: predicated region fallthrough
CT: control target
= control target key end

     0   :  { %s1253_s0 = inlined_call_operand.<no memory space> [shape: f32[1,1], index: 0, kind: input, shape index: {}]   ;;  %s1254_s1 = inlined_call_operand.<no memory space> [shape: f32[1,1], index: 1, kind: input, shape index: {}]   ;;  %s1255_s2 = inlined_call_operand.hbm [shape: f32[512,512], index: 2, kind: input, shape index: {}]   ;;  %s1256_s3 = inlined_call_operand.hbm [shape: f32[512,512], index: 3, kind: output, shape index: {}]  }
   0x1   :  { %8 = sst [smem:[#allocation2]] %s1253_s0 }
   0x2   :  { %9 = sst [smem:[#allocation3]] %s1254_s1 }
   0x3   :  { %10 = vsyncpa [#allocation5], 0 }
   0x4   :  { %12 = vsyncpa [#allocation5 + $0x1], 0 }
   0x5   :  { %13 = vsyncpa [#allocation6], 0 }
   0x6   :  { %15 = vsyncpa [#allocation6 + $0x1], 0  ;;  %s811_s16 = smov 0   ;;  %s813_s17 = smov 0  }
   0x7   :  { %s815_s18 = smov 0   ;;  %s817_s19 = smov 0  }
   0x8   :  { %s819_s20 = smov 0   ;;  %s821_s21 = smov 0  }
   0x9 LB: > { %s578_s0 = sadd.s32 4294967295, %s777_s21   ;;  %s579_s1 = sadd.s32 4294967294, %s777_s21   ;;  %s777_s21 = sphi %s821_s21, %s21_s21   ;;  %s773_s20 = sphi %s819_s20, %s1270_s20   ;;  %s769_s19 = sphi %s817_s19, %s1269_s19   ;;  %s765_s18 = sphi %s815_s18, %s1268_s18   ;;  %s761_s17 = sphi %s813_s17, %s1267_s17   ;;  %s757_s16 = sphi %s811_s16, %s1266_s16  }
   0xa   : > { %s33_s22 = sadd.s32 1, %s773_s20  ;;  %s84_s23 = sadd.s32 1, %s765_s18 }
   0xb   : > { %p35_p0 = scmp.ge.s32.totalorder %s33_s22, 4  ;;  %p91_p1 = scmp.ne.s32.totalorder %s765_s18, %s761_s17 }
   0xc   : > { %p92_p2 = scmp.eq.s32.totalorder %s777_s21, 0  ;;  %p97_p3 = scmp.ne.s32.totalorder %s761_s17, %s757_s16 }
   0xd   : > { %s1272_s22 = smov (%p35_p0, %s33_s22), 0  ;;  %p98_p5 = scmp.eq.s32.totalorder %s578_s0, 0 }
   0xe   : > { %p852_p4 = por %p92_p2, %p91_p1  ;;  %s79_s25 = ssub.s32 %s773_s20, %s1272_s22 }
   0xf   : > { %p123_p6 = scmp.eq.s32.totalorder %s578_s0, 3  ;;  %p82_p7 = scmp.eq.s32.totalorder %s79_s25, 0 }
  0x10   : > { %p858_p8 = por %p98_p5, %p97_p3  ;;  %p129_p10 = scmp.eq.s32.totalorder %s579_s1, 3 }
  0x11   : > { %p862_p9 = por %p123_p6, %p91_p1  ;;  %p611_p12 = scmp.lt.s32.totalorder %s777_s21, 4 }
  0x12   : > { %s867_s28 = scalar_select %p82_p7, %s765_s18, %s84_s23  }
  0x13   : > { %s1260_s27 = scalar_select %p862_p9, 1, 0 }
  0x14   : > { %p869_p11 = por %p129_p10, %p97_p3  ;;  %s155_s30 = sand.u32 1, %s765_s18  }
  0x15   : > { %s582_s4 = sshll.u32 %s155_s30, 9  ;;  %s596_s5 = sshll.u32 %s773_s20, 13 }
  0x16   : > { %s1261_s29 = scalar_select %p869_p11, 1, 0 }
  0x17   : > { %s879_s8 = scalar_lea.hbm %s1255_s2, %s596_s5  ;;  %s159_s9 = scalar_lea.vmem [#allocation4], %s582_s4 }
  0x18   : > { %s169_s10 = sshll.u32 %s159_s9, 4  ;;  %p885_p13 = pnand %p611_p12, %p852_p4  ;;  %s881_s10 = int_to_ptr.vmem [resolvable:$true] %s169_s10 }
  0x19   : > { %s890_s12 = scalar_lea.sflag [#allocation5], %s155_s30  ;;  %s665_s13 = scalar_lea.hbm %s879_s8, 8192 }
  0x1a   : > { %p666_p1 = scmp.ne.s32.totalorder %s879_s8, %s665_s13  ;;  %p667_p2 = pneg %p885_p13 }
  0x1b   : > { %s670_s0 = scalar_lea.hbm %s1255_s2, 32768  ;;  %p671_p4 = scmp.lt.u32.totalorder %s879_s8, %s1255_s2 }
  0x1c   : > { %p668_p3 = pnand %p667_p2, %p666_p1  ;;  %p672_p6 = scmp.lt.u32.totalorder %s670_s0, %s665_s13 }
  0x1d   : > { %p674_p10 = scmp.lt.u32.totalorder %s665_s13, %s879_s8 }
  0x1e   : > { %p669_p5 = pneg %p668_p3  ;;  %p673_p7 = por %p672_p6, %p671_p4 }
  0x20   : > { %p675_p12 = por %p674_p10, %p673_p7 }
  0x22   : > { %p676_p0 = pnand %p675_p12, %p669_p5 }
  0x24   : > { %679 = shalt.err (!%p676_p0)
}
  0x25   : > { %s680_s24 = scalar_lea.vmem %s881_s10, 8192  ;;  %s779_s25 = smov [#allocation4]  }
  0x26   : > { %p681_p1 = scmp.ne.s32.totalorder %s881_s10, %s680_s24  ;;  %s685_s30 = sshll.u32 %s779_s25, 4  ;;  %s686_s30 = int_to_ptr.vmem [resolvable:$false] %s685_s30 }
  0x27   : > { %s687_s4 = scalar_lea.vmem %s686_s30, 16384  ;;  %p688_p9 = scmp.lt.s32.totalorder %s881_s10, %s686_s30 }
  0x28   : > { %p683_p3 = pnand %p681_p1, %p667_p2  ;;  %p689_p4 = scmp.lt.s32.totalorder %s687_s4, %s680_s24 }
  0x2a   : > { %p684_p11 = pneg %p683_p3  ;;  %p690_p6 = por %p689_p4, %p688_p9 }
  0x2c   : > { %p691_p7 = pnand %p690_p6, %p684_p11 }
  0x2e   : > { %694 = shalt.err (!%p691_p7)
}
  0x2f   : > { %s780_s5 = smov 512   ;;  %s781_s6 = smov 32  }
  0x30   : > { %606 = dma.hbm_to_vmem [thread:$0]  (!%p885_p13), %s879_s8, 8192, %s881_s10, %s890_s12, %s780_s5, %s780_s5, %s781_s6  }
  0x31   : > { %p177_p0 = scmp.lt.s32.totalorder %s777_s21, 5  ;;  %p1263_p2 = scmp.ge.s32.totalorder %s777_s21, 1 }
  0x33   : > { %p178_p5 = pnand %p1263_p2, %p177_p0 }
  0x34   : > { %s922_s7 = sand.u32 (!%p178_p5), 1, %s761_s17  }
  0x35   : > { %181 = sbr.rel (%p178_p5) target bundleno = 124 (0x7c), region = 32  ;;  %s587_s9 = sshll.u32 (!%p178_p5), %s922_s7, 9 }
  0x36   : > { %s184_s13 = scalar_lea.sflag (!%p178_p5), [#allocation5], %s922_s7  ;;  %s928_s14 = scalar_lea.vmem (!%p178_p5), [#allocation4], %s587_s9 }
  0x3c   : > { %748 = dma.done.wait (%p858_p8), %s184_s13, 8192  }
  0x3d   : > { %750 = vsyncadd (%p858_p8), %s184_s13, 4294959104  ;;  %s214_s8 = sld [smem:[#allocation2]]  ;;  %v216_v0 = vld [vmem:[%s928_s14] sm:$0xff]  ;;  %v217_v3 = vld [vmem:[%s928_s14 + $0x8] sm:$0xff]  ;;  %s967_s26 = scalar_lea.vmem [#allocation7], %s587_s9 }
  0x3e   : > { %s215_s10 = sld [smem:[#allocation3]]  ;;  %v218_v6 = vld [vmem:[%s928_s14 + $0x10] sm:$0xff]  ;;  %v219_v7 = vld [vmem:[%s928_s14 + $0x18] sm:$0xff]  ;;  %v220_v8 = vld [vmem:[%s928_s14 + $0x20] sm:$0xff]  ;;  %s598_s11 = sshll.u32 %s769_s19, 13 }
  0x3f   : > { %v221_v12 = vld [vmem:[%s928_s14 + $0x28] sm:$0xff]  ;;  %v222_v13 = vld [vmem:[%s928_s14 + $0x30] sm:$0xff]  ;;  %v223_v14 = vld [vmem:[%s928_s14 + $0x38] sm:$0xff]  ;;  %s491_s12 = sshll.u32 %s967_s26, 4  ;;  %s1196_s0 = scalar_lea.hbm %s1256_s3, %s598_s11  ;;  %s1198_s12 = int_to_ptr.vmem [resolvable:$true] %s491_s12 }
  0x40   : > { %v224_v19 = vld [vmem:[%s928_s14 + $0x40] sm:$0xff]  ;;  %v225_v20 = vld [vmem:[%s928_s14 + $0x48] sm:$0xff]  ;;  %v226_v21 = vld [vmem:[%s928_s14 + $0x50] sm:$0xff]  ;;  %s475_s1 = scalar_lea.sflag [#allocation6], %s922_s7  ;;  %s695_s23 = scalar_lea.vmem %s1198_s12, 8192 }
  0x41   : > { %v227_v26 = vld [vmem:[%s928_s14 + $0x58] sm:$0xff]  ;;  %v228_v27 = vld [vmem:[%s928_s14 + $0x60] sm:$0xff]  ;;  %v229_v28 = vld [vmem:[%s928_s14 + $0x68] sm:$0xff]  ;;  %p696_p8 = scmp.ne.s32.totalorder %s1198_s12, %s695_s23  ;;  %p1264_p9 = scmp.ne.s32.totalorder %s1260_s27, 0 }
  0x42   : > { %v230_v33 = vld [vmem:[%s928_s14 + $0x70] sm:$0xff]  ;;  %v231_v34 = vld [vmem:[%s928_s14 + $0x78] sm:$0xff]  ;;  %v232_v39 = vld [vmem:[%s928_s14 + $0x80] sm:$0xff]  ;;  %s782_s24 = smov [#allocation7]  }
  0x43   : > { %v935_v1 = vstv %s214_s8  ;;  %v233_v40 = vld [vmem:[%s928_s14 + $0x88] sm:$0xff]  ;;  %v234_v45 = vld [vmem:[%s928_s14 + $0x90] sm:$0xff]  ;;  %v235_v46 = vld [vmem:[%s928_s14 + $0x98] sm:$0xff]  ;;  %p697_p11 = pnand %p696_p8, %p1264_p9  ;;  %s699_s25 = sshll.u32 %s782_s24, 4  ;;  %s700_s25 = int_to_ptr.vmem [resolvable:$false] %s699_s25 }
  0x44   : > { %v937_v2 = vstv %s215_s10  ;;  %v281_v4 = vmul.f32 %v935_v1, %v216_v0  ;;  %v282_v5 = vmul.f32 %v935_v1, %v217_v3  ;;  %v283_v9 = vmul.f32 %v935_v1, %v218_v6  ;;  %v236_v47 = vld [vmem:[%s928_s14 + $0xa0] sm:$0xff]  ;;  %v237_v52 = vld [vmem:[%s928_s14 + $0xa8] sm:$0xff]  ;;  %v238_v53 = vld [vmem:[%s928_s14 + $0xb0] sm:$0xff]  ;;  %s701_s30 = scalar_lea.vmem %s700_s25, 16384  ;;  %p702_p10 = scmp.lt.s32.totalorder %s1198_s12, %s700_s25 }
  0x45   : > { %v284_v10 = vmul.f32 %v935_v1, %v219_v7  ;;  %v285_v11 = vmul.f32 %v935_v1, %v220_v8  ;;  %v286_v17 = vmul.f32 %v935_v1, %v221_v12  ;;  %v287_v18 = vmul.f32 %v935_v1, %v222_v13  ;;  %v239_v58 = vld [vmem:[%s928_s14 + $0xb8] sm:$0xff]  ;;  %v240_v63 = vld [vmem:[%s928_s14 + $0xc0] sm:$0xff]  ;;  %v241_v0 = vld [vmem:[%s928_s14 + $0xc8] sm:$0xff]  ;;  %p698_p13 = pneg %p697_p11  ;;  %p703_p12 = scmp.lt.s32.totalorder %s701_s30, %s695_s23 }
  0x46   : > { %v346_v15 = vadd.f32 %v937_v2, %v281_v4  ;;  %v347_v16 = vadd.f32 %v937_v2, %v282_v5  ;;  %v348_v22 = vadd.f32 %v937_v2, %v283_v9  ;;  %v288_v25 = vmul.f32 %v935_v1, %v223_v14  ;;  %v242_v7 = vld [vmem:[%s928_s14 + $0xd0] sm:$0xff]  ;;  %v243_v8 = vld [vmem:[%s928_s14 + $0xd8] sm:$0xff]  ;;  %v244_v9 = vld [vmem:[%s928_s14 + $0xe0] sm:$0xff] }
  0x47   : > { %v349_v23 = vadd.f32 %v937_v2, %v284_v10  ;;  %v350_v24 = vadd.f32 %v937_v2, %v285_v11  ;;  %v351_v29 = vadd.f32 %v937_v2, %v286_v17  ;;  %v352_v30 = vadd.f32 %v937_v2, %v287_v18  ;;  %v245_v14 = vld [vmem:[%s928_s14 + $0xe8] sm:$0xff]  ;;  %p704_p1 = por %p703_p12, %p702_p10 }
  0x48   : > { %410 = vst [vmem:[%s967_s26] sm:$0xff] %v346_v15  ;;  %411 = vst [vmem:[%s967_s26 + $0x8] sm:$0xff] %v347_v16  ;;  %v289_v31 = vmul.f32 %v935_v1, %v224_v19  ;;  %v290_v32 = vmul.f32 %v935_v1, %v225_v20  ;;  %v353_v35 = vadd.f32 %v937_v2, %v288_v25  ;;  %v246_v15 = vld [vmem:[%s928_s14 + $0xf0] sm:$0xff]  ;;  %v247_v20 = vld [vmem:[%s928_s14 + $0xf8] sm:$0xff] }
  0x49   : > { %412 = vst [vmem:[%s967_s26 + $0x10] sm:$0xff] %v348_v22  ;;  %413 = vst [vmem:[%s967_s26 + $0x18] sm:$0xff] %v349_v23  ;;  %v291_v36 = vmul.f32 %v935_v1, %v226_v21  ;;  %v292_v37 = vmul.f32 %v935_v1, %v227_v26  ;;  %v293_v38 = vmul.f32 %v935_v1, %v228_v27  ;;  %v248_v25 = vld [vmem:[%s928_s14 + $0x100] sm:$0xff]  ;;  %v249_v26 = vld [vmem:[%s928_s14 + $0x108] sm:$0xff]  ;;  %p705_p3 = pnand %p704_p1, %p698_p13 }
  0x4a   : > { %414 = vst [vmem:[%s967_s26 + $0x20] sm:$0xff] %v350_v24  ;;  %415 = vst [vmem:[%s967_s26 + $0x28] sm:$0xff] %v351_v29  ;;  %v354_v41 = vadd.f32 %v937_v2, %v289_v31  ;;  %v355_v42 = vadd.f32 %v937_v2, %v290_v32  ;;  %v294_v43 = vmul.f32 %v935_v1, %v229_v28  ;;  %v250_v31 = vld [vmem:[%s928_s14 + $0x110] sm:$0xff]  ;;  %v251_v32 = vld [vmem:[%s928_s14 + $0x118] sm:$0xff] }
  0x4b   : > { %416 = vst [vmem:[%s967_s26 + $0x30] sm:$0xff] %v352_v30  ;;  %v295_v44 = vmul.f32 %v935_v1, %v230_v33  ;;  %417 = vst [vmem:[%s967_s26 + $0x38] sm:$0xff] %v353_v35  ;;  %v356_v48 = vadd.f32 %v937_v2, %v291_v36  ;;  %v357_v49 = vadd.f32 %v937_v2, %v292_v37  ;;  %v252_v33 = vld [vmem:[%s928_s14 + $0x120] sm:$0xff] }
  0x4c   : > { %v358_v50 = vadd.f32 %v937_v2, %v293_v38  ;;  %v296_v51 = vmul.f32 %v935_v1, %v231_v34  ;;  %418 = vst [vmem:[%s967_s26 + $0x40] sm:$0xff] %v354_v41  ;;  %419 = vst [vmem:[%s967_s26 + $0x48] sm:$0xff] %v355_v42  ;;  %v359_v54 = vadd.f32 %v937_v2, %v294_v43  ;;  %v253_v38 = vld [vmem:[%s928_s14 + $0x128] sm:$0xff] }
  0x4d   : > { %v360_v55 = vadd.f32 %v937_v2, %v295_v44  ;;  %v297_v56 = vmul.f32 %v935_v1, %v232_v39  ;;  %v298_v57 = vmul.f32 %v935_v1, %v233_v40  ;;  %420 = vst [vmem:[%s967_s26 + $0x50] sm:$0xff] %v356_v48  ;;  %421 = vst [vmem:[%s967_s26 + $0x58] sm:$0xff] %v357_v49  ;;  %v254_v39 = vld [vmem:[%s928_s14 + $0x130] sm:$0xff]  ;;  %v255_v44 = vld [vmem:[%s928_s14 + $0x138] sm:$0xff] }
  0x4e   : > { %422 = vst [vmem:[%s967_s26 + $0x60] sm:$0xff] %v358_v50  ;;  %v361_v59 = vadd.f32 %v937_v2, %v296_v51  ;;  %v299_v60 = vmul.f32 %v935_v1, %v234_v45  ;;  %v300_v61 = vmul.f32 %v935_v1, %v235_v46  ;;  %v301_v62 = vmul.f32 %v935_v1, %v236_v47  ;;  %v256_v49 = vld [vmem:[%s928_s14 + $0x140] sm:$0xff]  ;;  %v257_v50 = vld [vmem:[%s928_s14 + $0x148] sm:$0xff] }
  0x4f   : > { %423 = vst [vmem:[%s967_s26 + $0x68] sm:$0xff] %v359_v54  ;;  %424 = vst [vmem:[%s967_s26 + $0x70] sm:$0xff] %v360_v55  ;;  %v362_v3 = vadd.f32 %v937_v2, %v297_v56  ;;  %v363_v4 = vadd.f32 %v937_v2, %v298_v57  ;;  %v302_v5 = vmul.f32 %v935_v1, %v237_v52  ;;  %v258_v55 = vld [vmem:[%s928_s14 + $0x150] sm:$0xff]  ;;  %v259_v56 = vld [vmem:[%s928_s14 + $0x158] sm:$0xff] }
  0x50   : > { %v303_v6 = vmul.f32 %v935_v1, %v238_v53  ;;  %425 = vst [vmem:[%s967_s26 + $0x78] sm:$0xff] %v361_v59  ;;  %v364_v10 = vadd.f32 %v937_v2, %v299_v60  ;;  %v365_v11 = vadd.f32 %v937_v2, %v300_v61  ;;  %v366_v12 = vadd.f32 %v937_v2, %v301_v62  ;;  %v260_v57 = vld [vmem:[%s928_s14 + $0x160] sm:$0xff]  ;;  %v261_v62 = vld [vmem:[%s928_s14 + $0x168] sm:$0xff] }
  0x51   : > { %v304_v13 = vmul.f32 %v935_v1, %v239_v58  ;;  %426 = vst [vmem:[%s967_s26 + $0x80] sm:$0xff] %v362_v3  ;;  %427 = vst [vmem:[%s967_s26 + $0x88] sm:$0xff] %v363_v4  ;;  %v367_v16 = vadd.f32 %v937_v2, %v302_v5  ;;  %v305_v18 = vmul.f32 %v935_v1, %v240_v63  ;;  %v262_v63 = vld [vmem:[%s928_s14 + $0x170] sm:$0xff] }
  0x52   : > { %v368_v17 = vadd.f32 %v937_v2, %v303_v6  ;;  %v306_v19 = vmul.f32 %v935_v1, %v241_v0  ;;  %428 = vst [vmem:[%s967_s26 + $0x90] sm:$0xff] %v364_v10  ;;  %429 = vst [vmem:[%s967_s26 + $0x98] sm:$0xff] %v365_v11  ;;  %v307_v22 = vmul.f32 %v935_v1, %v242_v7  ;;  %v263_v6 = vld [vmem:[%s928_s14 + $0x178] sm:$0xff]  ;;  %v264_v11 = vld [vmem:[%s928_s14 + $0x180] sm:$0xff] }
  0x53   : > { %430 = vst [vmem:[%s967_s26 + $0xa0] sm:$0xff] %v366_v12  ;;  %v369_v21 = vadd.f32 %v937_v2, %v304_v13  ;;  %v308_v23 = vmul.f32 %v935_v1, %v243_v8  ;;  %v309_v24 = vmul.f32 %v935_v1, %v244_v9  ;;  %431 = vst [vmem:[%s967_s26 + $0xa8] sm:$0xff] %v367_v16  ;;  %v265_v12 = vld [vmem:[%s928_s14 + $0x188] sm:$0xff] }
  0x54   : > { %432 = vst [vmem:[%s967_s26 + $0xb0] sm:$0xff] %v368_v17  ;;  %v370_v27 = vadd.f32 %v937_v2, %v305_v18  ;;  %v371_v28 = vadd.f32 %v937_v2, %v306_v19  ;;  %v310_v29 = vmul.f32 %v935_v1, %v245_v14  ;;  %v311_v30 = vmul.f32 %v935_v1, %v246_v15  ;;  %v266_v17 = vld [vmem:[%s928_s14 + $0x190] sm:$0xff]  ;;  %v267_v18 = vld [vmem:[%s928_s14 + $0x198] sm:$0xff]  ;;  %v268_v19 = vld [vmem:[%s928_s14 + $0x1a0] sm:$0xff] }
  0x55   : > { %433 = vst [vmem:[%s967_s26 + $0xb8] sm:$0xff] %v369_v21  ;;  %v372_v34 = vadd.f32 %v937_v2, %v307_v22  ;;  %v373_v35 = vadd.f32 %v937_v2, %v308_v23  ;;  %v374_v36 = vadd.f32 %v937_v2, %v309_v24  ;;  %v312_v37 = vmul.f32 %v935_v1, %v247_v20  ;;  %v269_v24 = vld [vmem:[%s928_s14 + $0x1a8] sm:$0xff] }
  0x56   : > { %434 = vst [vmem:[%s967_s26 + $0xc0] sm:$0xff] %v370_v27  ;;  %435 = vst [vmem:[%s967_s26 + $0xc8] sm:$0xff] %v371_v28  ;;  %v375_v40 = vadd.f32 %v937_v2, %v310_v29  ;;  %v376_v41 = vadd.f32 %v937_v2, %v311_v30  ;;  %v313_v42 = vmul.f32 %v935_v1, %v248_v25  ;;  %v270_v25 = vld [vmem:[%s928_s14 + $0x1b0] sm:$0xff]  ;;  %v271_v30 = vld [vmem:[%s928_s14 + $0x1b8] sm:$0xff] }
  0x57   : > { %v314_v43 = vmul.f32 %v935_v1, %v249_v26  ;;  %436 = vst [vmem:[%s967_s26 + $0xd0] sm:$0xff] %v372_v34  ;;  %437 = vst [vmem:[%s967_s26 + $0xd8] sm:$0xff] %v373_v35  ;;  %v377_v45 = vadd.f32 %v937_v2, %v312_v37  ;;  %v315_v46 = vmul.f32 %v935_v1, %v250_v31  ;;  %v272_v35 = vld [vmem:[%s928_s14 + $0x1c0] sm:$0xff] }
  0x58   : > { %438 = vst [vmem:[%s967_s26 + $0xe0] sm:$0xff] %v374_v36  ;;  %v316_v47 = vmul.f32 %v935_v1, %v251_v32  ;;  %v317_v48 = vmul.f32 %v935_v1, %v252_v33  ;;  %439 = vst [vmem:[%s967_s26 + $0xe8] sm:$0xff] %v375_v40  ;;  %v378_v51 = vadd.f32 %v937_v2, %v313_v42  ;;  %v273_v36 = vld [vmem:[%s928_s14 + $0x1c8] sm:$0xff]  ;;  %v275_v42 = vld [vmem:[%s928_s14 + $0x1d8] sm:$0xff] }
  0x59   : > { %440 = vst [vmem:[%s967_s26 + $0xf0] sm:$0xff] %v376_v41  ;;  %v379_v52 = vadd.f32 %v937_v2, %v314_v43  ;;  %v318_v53 = vmul.f32 %v935_v1, %v253_v38  ;;  %v319_v54 = vmul.f32 %v935_v1, %v254_v39  ;;  %441 = vst [vmem:[%s967_s26 + $0xf8] sm:$0xff] %v377_v45  ;;  %v274_v41 = vld [vmem:[%s928_s14 + $0x1d0] sm:$0xff]  ;;  %v276_v43 = vld [vmem:[%s928_s14 + $0x1e0] sm:$0xff] }
  0x5a   : > { %v380_v58 = vadd.f32 %v937_v2, %v315_v46  ;;  %v381_v59 = vadd.f32 %v937_v2, %v316_v47  ;;  %v382_v60 = vadd.f32 %v937_v2, %v317_v48  ;;  %v320_v61 = vmul.f32 %v935_v1, %v255_v44  ;;  %442 = vst [vmem:[%s967_s26 + $0x100] sm:$0xff] %v378_v51  ;;  %v277_v48 = vld [vmem:[%s928_s14 + $0x1e8] sm:$0xff] }
  0x5b   : > { %443 = vst [vmem:[%s967_s26 + $0x108] sm:$0xff] %v379_v52  ;;  %v383_v0 = vadd.f32 %v937_v2, %v318_v53  ;;  %v384_v3 = vadd.f32 %v937_v2, %v319_v54  ;;  %v321_v4 = vmul.f32 %v935_v1, %v256_v49  ;;  %v322_v5 = vmul.f32 %v935_v1, %v257_v50  ;;  %v278_v49 = vld [vmem:[%s928_s14 + $0x1f0] sm:$0xff]  ;;  %v279_v54 = vld [vmem:[%s928_s14 + $0x1f8] sm:$0xff] }
  0x5c   : > { %444 = vst [vmem:[%s967_s26 + $0x110] sm:$0xff] %v380_v58  ;;  %445 = vst [vmem:[%s967_s26 + $0x118] sm:$0xff] %v381_v59  ;;  %v385_v7 = vadd.f32 %v937_v2, %v320_v61  ;;  %v323_v8 = vmul.f32 %v935_v1, %v258_v55  ;;  %v324_v9 = vmul.f32 %v935_v1, %v259_v56 }
  0x5d   : > { %446 = vst [vmem:[%s967_s26 + $0x120] sm:$0xff] %v382_v60  ;;  %v325_v10 = vmul.f32 %v935_v1, %v260_v57  ;;  %447 = vst [vmem:[%s967_s26 + $0x128] sm:$0xff] %v383_v0  ;;  %v386_v13 = vadd.f32 %v937_v2, %v321_v4  ;;  %v387_v14 = vadd.f32 %v937_v2, %v322_v5 }
  0x5e   : > { %448 = vst [vmem:[%s967_s26 + $0x130] sm:$0xff] %v384_v3  ;;  %v326_v15 = vmul.f32 %v935_v1, %v261_v62  ;;  %v327_v16 = vmul.f32 %v935_v1, %v262_v63  ;;  %449 = vst [vmem:[%s967_s26 + $0x138] sm:$0xff] %v385_v7  ;;  %v388_v20 = vadd.f32 %v937_v2, %v323_v8 }
  0x5f   : > { %v389_v21 = vadd.f32 %v937_v2, %v324_v9  ;;  %v390_v22 = vadd.f32 %v937_v2, %v325_v10  ;;  %v328_v23 = vmul.f32 %v935_v1, %v263_v6  ;;  %450 = vst [vmem:[%s967_s26 + $0x140] sm:$0xff] %v386_v13  ;;  %451 = vst [vmem:[%s967_s26 + $0x148] sm:$0xff] %v387_v14 }
  0x60   : > { %v391_v26 = vadd.f32 %v937_v2, %v326_v15  ;;  %v392_v27 = vadd.f32 %v937_v2, %v327_v16  ;;  %v329_v28 = vmul.f32 %v935_v1, %v264_v11  ;;  %v330_v29 = vmul.f32 %v935_v1, %v265_v12  ;;  %452 = vst [vmem:[%s967_s26 + $0x150] sm:$0xff] %v388_v20 }
  0x61   : > { %453 = vst [vmem:[%s967_s26 + $0x158] sm:$0xff] %v389_v21  ;;  %454 = vst [vmem:[%s967_s26 + $0x160] sm:$0xff] %v390_v22  ;;  %v393_v31 = vadd.f32 %v937_v2, %v328_v23  ;;  %v331_v32 = vmul.f32 %v935_v1, %v266_v17  ;;  %v332_v33 = vmul.f32 %v935_v1, %v267_v18 }
  0x62   : > { %v333_v34 = vmul.f32 %v935_v1, %v268_v19  ;;  %455 = vst [vmem:[%s967_s26 + $0x168] sm:$0xff] %v391_v26  ;;  %456 = vst [vmem:[%s967_s26 + $0x170] sm:$0xff] %v392_v27  ;;  %v394_v37 = vadd.f32 %v937_v2, %v329_v28  ;;  %v395_v38 = vadd.f32 %v937_v2, %v330_v29 }
  0x63   : > { %v334_v39 = vmul.f32 %v935_v1, %v269_v24  ;;  %v335_v40 = vmul.f32 %v935_v1, %v270_v25  ;;  %457 = vst [vmem:[%s967_s26 + $0x178] sm:$0xff] %v393_v31  ;;  %v396_v44 = vadd.f32 %v937_v2, %v331_v32  ;;  %v397_v45 = vadd.f32 %v937_v2, %v332_v33 }
  0x64   : > { %v398_v46 = vadd.f32 %v937_v2, %v333_v34  ;;  %v336_v47 = vmul.f32 %v935_v1, %v271_v30  ;;  %458 = vst [vmem:[%s967_s26 + $0x180] sm:$0xff] %v394_v37  ;;  %459 = vst [vmem:[%s967_s26 + $0x188] sm:$0xff] %v395_v38  ;;  %v337_v52 = vmul.f32 %v935_v1, %v272_v35 }
  0x65   : > { %v399_v50 = vadd.f32 %v937_v2, %v334_v39  ;;  %v400_v51 = vadd.f32 %v937_v2, %v335_v40  ;;  %v338_v53 = vmul.f32 %v935_v1, %v273_v36  ;;  %460 = vst [vmem:[%s967_s26 + $0x190] sm:$0xff] %v396_v44  ;;  %461 = vst [vmem:[%s967_s26 + $0x198] sm:$0xff] %v397_v45 }
  0x66   : > { %462 = vst [vmem:[%s967_s26 + $0x1a0] sm:$0xff] %v398_v46  ;;  %v401_v55 = vadd.f32 %v937_v2, %v336_v47  ;;  %v339_v56 = vmul.f32 %v935_v1, %v274_v41  ;;  %v340_v57 = vmul.f32 %v935_v1, %v275_v42  ;;  %v341_v58 = vmul.f32 %v935_v1, %v276_v43 }
  0x67   : > { %463 = vst [vmem:[%s967_s26 + $0x1a8] sm:$0xff] %v399_v50  ;;  %464 = vst [vmem:[%s967_s26 + $0x1b0] sm:$0xff] %v400_v51  ;;  %v402_v59 = vadd.f32 %v937_v2, %v337_v52  ;;  %v403_v60 = vadd.f32 %v937_v2, %v338_v53  ;;  %v342_v61 = vmul.f32 %v935_v1, %v277_v48 }
  0x68   : > { %v343_v62 = vmul.f32 %v935_v1, %v278_v49  ;;  %465 = vst [vmem:[%s967_s26 + $0x1b8] sm:$0xff] %v401_v55  ;;  %v404_v63 = vadd.f32 %v937_v2, %v339_v56  ;;  %v405_v0 = vadd.f32 %v937_v2, %v340_v57  ;;  %v406_v3 = vadd.f32 %v937_v2, %v341_v58 }
  0x69   : > { %v344_v4 = vmul.f32 %v935_v1, %v279_v54  ;;  %466 = vst [vmem:[%s967_s26 + $0x1c0] sm:$0xff] %v402_v59  ;;  %467 = vst [vmem:[%s967_s26 + $0x1c8] sm:$0xff] %v403_v60  ;;  %v407_v5 = vadd.f32 %v937_v2, %v342_v61 }
  0x6a   : > { %v408_v6 = vadd.f32 %v937_v2, %v343_v62  ;;  %468 = vst [vmem:[%s967_s26 + $0x1d0] sm:$0xff] %v404_v63  ;;  %469 = vst [vmem:[%s967_s26 + $0x1d8] sm:$0xff] %v405_v0 }
  0x6b   : > { %470 = vst [vmem:[%s967_s26 + $0x1e0] sm:$0xff] %v406_v3  ;;  %v409_v1 = vadd.f32 %v937_v2, %v344_v4  ;;  %471 = vst [vmem:[%s967_s26 + $0x1e8] sm:$0xff] %v407_v5 }
  0x6c   : > { %472 = vst [vmem:[%s967_s26 + $0x1f0] sm:$0xff] %v408_v6 }
  0x6d   : > { %473 = vst [vmem:[%s967_s26 + $0x1f8] sm:$0xff] %v409_v1 }
  0x6e   : > { %708 = shalt.err (!%p705_p3)
}
  0x6f   : > { %s709_s4 = scalar_lea.hbm %s1196_s0, 8192  ;;  %s713_s9 = scalar_lea.hbm %s1256_s3, 32768 }
  0x70   : > { %p710_p4 = scmp.ne.s32.totalorder %s1196_s0, %s709_s4  ;;  %p714_p0 = scmp.lt.u32.totalorder %s1196_s0, %s1256_s3 }
  0x71   : > { %p715_p2 = scmp.lt.u32.totalorder %s713_s9, %s709_s4  ;;  %p717_p8 = scmp.lt.u32.totalorder %s709_s4, %s1196_s0 }
  0x72   : > { %p711_p6 = pnand %p710_p4, %p1264_p9 }
  0x73   : > { %p716_p5 = por %p715_p2, %p714_p0 }
  0x74   : > { %p712_p7 = pneg %p711_p6 }
  0x75   : > { %p718_p11 = por %p717_p8, %p716_p5 }
  0x77   : > { %p719_p13 = pnand %p718_p11, %p712_p7 }
  0x79   : > { %722 = shalt.err (!%p719_p13)
}
  0x7a   : > { %s783_s8 = smov 512   ;;  %s784_s10 = smov 32  }
  0x7b   : > { %601 = dma.vmem_to_hbm [thread:$0]  (%p1264_p9), %s1198_s12, 8192, %s1196_s0, %s475_s1, %s783_s8, %s783_s8, %s784_s10  }
  0x7c PF: > { %p612_p10 = scmp.ge.s32.totalorder %s777_s21, 2  ;;  %s506_s26 = sand.u32 1, %s757_s16  }
  0x7d   : > { %p1265_p12 = scmp.ne.s32.totalorder %s1261_s29, 0  ;;  %s507_s11 = scalar_lea.sflag [#allocation6], %s506_s26 }
  0x7f   : > { %p608_p1 = pnand %p612_p10, %p1265_p12 }
  0x81   : > { %752 = dma.done.wait (!%p608_p1), %s507_s11, 8192  }
  0x82   : > { %754 = vsyncadd (!%p608_p1), %s507_s11, 4294959104  ;;  %s21_s21 = sadd.s32 1, %s777_s21   ;;  %s1266_s16 = smov %s761_s17 }
  0x83   : > { %p18_p3 = scmp.ge.s32.totalorder %s21_s21, 6   ;;  %s1267_s17 = smov %s765_s18 }
  0x84   : > { %s1268_s18 = smov %s867_s28  ;;  %s1269_s19 = smov %s773_s20 }
  0x85   : > { %s1270_s20 = smov %s1272_s22  ;;  %20 = sbr.rel (!%p18_p3) target bundleno = 9 (0x9), region = 77 }
  0x8c   :  { %512 = vsyncpa [#allocation5], 1 }
  0x8d   :  { %514 = vsyncpa [#allocation5 + $0x1], 1 }
  0x8e   :  { %515 = vsyncpa [#allocation6], 1 }
  0x8f   :  { %517 = vsyncpa [#allocation6 + $0x1], 1 }

</bundles_post_ra>
